<compile_context>
chip_gen: v6e
topology: v6e:2x2x1
jax: 0.10.0
libtpu: 0.0.40
codegen_flags: <defaults>
</compile_context>

<pallas_src>
import functools
import math

import jax
import jax.numpy as jnp
from jax import lax
from jax.experimental import pallas as pl
from jax.experimental.pallas import tpu as pltpu

LANE = 128
NEG_INF = -1e30          # additive mask value for non-edges
VMEM_LIMIT = 48 * 1024 * 1024   # <= 64 MiB/TC on v7x, well under 128 MiB on v5e/v6e


def _round_up(v, m):
    return ((v + m - 1) // m) * m


# ---------------------------------------------------------------------------
# Kernel 1: node-wise projection, residual(+bias) projection, attention logits.
# ---------------------------------------------------------------------------
def _proj_kernel(x_ref, w_ref, attl_ref, attr_ref, bias_ref, *rest,
                 heads, cout, hcp, use_res_fc):
    if use_res_fc:
        wres_ref, xlin_ref, res_ref, al_ref, ar_ref = rest
    else:
        xlin_ref, res_ref, al_ref, ar_ref = rest

    x = x_ref[...].astype(jnp.bfloat16)                           # [T, Cin_p]
    xl = jnp.dot(x, w_ref[...], preferred_element_type=jnp.float32)  # [T, hcp] f32
    xlin_ref[...] = xl.astype(jnp.bfloat16)

    if use_res_fc:
        res = jnp.dot(x, wres_ref[...], preferred_element_type=jnp.float32)
    else:
        # PyG reference: x_res = x_lin when res_fc is None (residual=True).
        res = xl
    res_ref[...] = res + bias_ref[...]                            # bias folded here

    # Per-node / per-head attention logits (hoisted out of the attention kernel).
    attl = attl_ref[...]                                          # [1, hcp] f32
    attr = attr_ref[...]                                          # [1, hcp] f32
    prod_l = xl * attl
    prod_r = xl * attr
    col = lax.broadcasted_iota(jnp.int32, (1, hcp), 1)
    al_cols, ar_cols = [], []
    for h in range(heads):                                        # heads <= 2, static
        lanes = (col >= h * cout) & (col < (h + 1) * cout)
        al_cols.append(jnp.sum(jnp.where(lanes, prod_l, 0.0), axis=-1, keepdims=True))
        ar_cols.append(jnp.sum(jnp.where(lanes, prod_r, 0.0), axis=-1, keepdims=True))
    al_ref[...] = jnp.concatenate(al_cols, axis=-1)               # [T, heads]
    ar_ref[...] = jnp.concatenate(ar_cols, axis=-1)               # [T, heads]


# ---------------------------------------------------------------------------
# Kernel 2: masked per-target softmax attention + aggregation (online softmax
# over source tiles, block-sparse skip), residual, optional ELU.
# ---------------------------------------------------------------------------
def _attn_kernel(order_ref, counts_ref, ar_ref, al_ref, xs_ref, adj_ref, res_ref,
                 out_ref, m_sc, l_sc, acc_sc, *,
                 heads, cout, hcp, neg_slope, apply_elu):
    i = pl.program_id(0)
    j = pl.program_id(1)
    nj = pl.num_programs(1)

    @pl.when(j == 0)
    def _init():
        m_sc[...] = jnp.full_like(m_sc, NEG_INF)
        l_sc[...] = jnp.zeros_like(l_sc)
        acc_sc[...] = jnp.zeros_like(acc_sc)

    # Skip compute for (dst, src) tile pairs with no edges (block sparsity).
    @pl.when(j < counts_ref[i])
    def _compute():
        mask = adj_ref[...] != 0                       # [TD, TS] bool (from int8)
        xs = xs_ref[...]                               # [TS, hcp] bf16 (sources)
        for h in range(heads):                         # static unroll (heads <= 2)
            ar = ar_ref[:, h:h + 1]                    # [TD, 1]  f32 (target logit)
            al = al_ref[h:h + 1, :]                    # [1, TS]  f32 (source logit)

            # scores[i, j] = leaky_relu(alpha_r[i] + alpha_l[j]) masked to edges.
            s = ar + al                                # [TD, TS]
            s = jnp.where(s >= 0, s, neg_slope * s)
            s = jnp.where(mask, s, jnp.float32(NEG_INF))

            # ---- online softmax update ----
            m_prev = m_sc[h]                           # [TD, 1]
            m_new = jnp.maximum(m_prev, jnp.max(s, axis=-1, keepdims=True))
            m_safe = jnp.maximum(m_new, jnp.float32(-1e20))   # isolated-row guard
            p = jnp.exp(s - m_safe)                    # masked entries -> 0
            corr = jnp.exp(m_prev - m_new)             # <= 1 (rescale old partials)

            l_sc[h] = corr * l_sc[h] + jnp.sum(p, axis=-1, keepdims=True)
            acc_sc[h] = corr * acc_sc[h] + jnp.dot(
                p.astype(jnp.bfloat16), xs, preferred_element_type=jnp.float32)
            m_sc[h] = m_new

    @pl.when(j == nj - 1)
    def _finalize():
        out = res_ref[...]                             # [TD, hcp] f32, bias folded
        col = lax.broadcasted_iota(jnp.int32, (1, hcp), 1)
        for h in range(heads):
            inv_l = pl.reciprocal(jnp.maximum(l_sc[h], jnp.float32(1e-16)),
                                  approx=True)         # [TD, 1], EUP
            head_lanes = (col >= h * cout) & (col < (h + 1) * cout)
            out = jnp.where(head_lanes, out + acc_sc[h] * inv_l, out)
        if apply_elu:
            out = jnp.where(out > 0, out, jnp.exp(jnp.minimum(out, 0.0)) - 1.0)
        out_ref[...] = out.astype(out_ref.dtype)       # lane-dense 128-wide store


# ---------------------------------------------------------------------------
# Layer wrapper: two pallas_calls with tiled grids.
# ---------------------------------------------------------------------------
def agdn_layer(x_pad, lp, adj_i8, order, counts, *, apply_elu, out_dtype,
               neg_slope=0.2, tile_n=256, tile_dst=256, tile_src=512):
    n_pad, cin_pad = x_pad.shape
    heads, cout, hcp = lp["heads"], lp["cout"], lp["hcp"]
    use_res_fc = lp["wres_p"] is not None
    assert n_pad % tile_n == 0 and n_pad % tile_dst == 0 and n_pad % tile_src == 0
    nd, ns = n_pad // tile_dst, n_pad // tile_src

    # ---- projection + attention logits ----
    proj_in = [x_pad, lp["w_p"], lp["attl_p"], lp["attr_p"], lp["bias_p"]]
    proj_specs = [pl.BlockSpec((tile_n, cin_pad), lambda i: (i, 0)),
                  pl.BlockSpec((cin_pad, hcp), lambda i: (0, 0)),
                  pl.BlockSpec((1, hcp), lambda i: (0, 0)),
                  pl.BlockSpec((1, hcp), lambda i: (0, 0)),
                  pl.BlockSpec((1, hcp), lambda i: (0, 0))]
    if use_res_fc:
        proj_in.append(lp["wres_p"])
        proj_specs.append(pl.BlockSpec((cin_pad, hcp), lambda i: (0, 0)))

    x_lin, res, al, ar = pl.pallas_call(
        functools.partial(_proj_kernel, heads=heads, cout=cout, hcp=hcp,
                          use_res_fc=use_res_fc),
        grid=(n_pad // tile_n,),
        in_specs=proj_specs,
        out_specs=[pl.BlockSpec((tile_n, hcp), lambda i: (i, 0)),
                   pl.BlockSpec((tile_n, hcp), lambda i: (i, 0)),
                   pl.BlockSpec((tile_n, heads), lambda i: (i, 0)),
                   pl.BlockSpec((tile_n, heads), lambda i: (i, 0))],
        out_shape=[jax.ShapeDtypeStruct((n_pad, hcp), jnp.bfloat16),
                   jax.ShapeDtypeStruct((n_pad, hcp), jnp.float32),
                   jax.ShapeDtypeStruct((n_pad, heads), jnp.float32),
                   jax.ShapeDtypeStruct((n_pad, heads), jnp.float32)],
        compiler_params=pltpu.CompilerParams(
            dimension_semantics=("parallel",),
            vmem_limit_bytes=VMEM_LIMIT),
    )(*proj_in)

    al_t = jnp.transpose(al)                      # [heads, n_pad]: lane-dense src rows

    # ---- attention + aggregation (block-sparse over src tiles) ----
    flops = 2.0 * heads * n_pad * n_pad * hcp + 12.0 * heads * n_pad * n_pad
    bytes_accessed = (n_pad * n_pad                       # int8 adjacency
                      + 2 * nd * n_pad * hcp              # x_lin sources (bf16, per dst tile)
                      + 4 * n_pad * hcp                   # residual (f32)
                      + jnp.dtype(out_dtype).itemsize * n_pad * hcp)

    grid_spec = pltpu.PrefetchScalarGridSpec(
        num_scalar_prefetch=2,                            # order (flat), counts
        grid=(nd, ns),
        in_specs=[
            pl.BlockSpec((tile_dst, heads), lambda i, j, o, c: (i, 0)),           # alpha_r
            pl.BlockSpec((heads, tile_src), lambda i, j, o, c: (0, o[i * ns + j])),  # alpha_l^T
            pl.BlockSpec((tile_src, hcp), lambda i, j, o, c: (o[i * ns + j], 0)),    # x_lin (src)
            pl.BlockSpec((tile_dst, tile_src), lambda i, j, o, c: (i, o[i * ns + j])),  # adj int8
            pl.BlockSpec((tile_dst, hcp), lambda i, j, o, c: (i, 0)),             # residual+bias
        ],
        out_specs=pl.BlockSpec((tile_dst, hcp), lambda i, j, o, c: (i, 0)),
        scratch_shapes=[
            pltpu.VMEM((heads, tile_dst, 1), jnp.float32),       # running max m
            pltpu.VMEM((heads, tile_dst, 1), jnp.float32),       # running sum l
            pltpu.VMEM((heads, tile_dst, hcp), jnp.float32),     # accumulator
        ])

    out = pl.pallas_call(
        functools.partial(_attn_kernel, heads=heads, cout=cout, hcp=hcp,
                          neg_slope=neg_slope, apply_elu=apply_elu),
        grid_spec=grid_spec,
        out_shape=jax.ShapeDtypeStruct((n_pad, hcp), out_dtype),
        compiler_params=pltpu.CompilerParams(
            dimension_semantics=("parallel", "arbitrary"),
            vmem_limit_bytes=VMEM_LIMIT),
        cost_estimate=pl.CostEstimate(
            flops=int(flops),
            transcendentals=int(2 * heads * n_pad * n_pad),
            bytes_accessed=int(bytes_accessed)),
    )(order, counts, ar, al_t, x_lin, adj_i8, res)
    return out


# ---------------------------------------------------------------------------
# Parameter init (torch shapes) and joint 128-lane padding of the parameters.
# ---------------------------------------------------------------------------
def init_agdn_params(key, in_channels, hidden_channels, out_channels,
                     num_layers=2, heads=1):
    """Deterministic xavier-uniform-style init matching the torch shapes."""
    layer_dims = [(in_channels, hidden_channels, heads)]
    for _ in range(num_layers - 2):
        layer_dims.append((hidden_channels * heads, hidden_channels, heads))
    layer_dims.append((hidden_channels * heads, out_channels, 1))

    params = []
    for (cin, cout, h) in layer_dims:
        key, k1, k2, k3, k4 = jax.random.split(key, 5)
        bw = math.sqrt(6.0 / (cin + h * cout))
        w = jax.random.uniform(k1, (cin, h * cout), jnp.float32, -bw, bw)
        ba = math.sqrt(6.0 / (h * cout + cout))
        attl = jax.random.uniform(k2, (h, cout), jnp.float32, -ba, ba)
        attr = jax.random.uniform(k3, (h, cout), jnp.float32, -ba, ba)
        wres = (jax.random.uniform(k4, (cin, h * cout), jnp.float32, -bw, bw)
                if cin != h * cout else None)
        bias = jnp.zeros((h * cout,), jnp.float32)
        params.append(dict(w=w, attl=attl, attr=attr, wres=wres, bias=bias,
                           cin=cin, cout=cout, heads=h))
    return params


def _prepare_layer(p, cin_true, cin_pad):
    """Pad a layer's parameters into the joint (heads*cout -> 128-lane) layout."""
    heads, cout = p["heads"], p["cout"]
    hc = heads * cout
    hcp = _round_up(hc, LANE)

    def pad_w(w):   # [cin_true, heads*cout] -> [cin_pad, hcp]
        return jnp.pad(w, ((0, cin_pad - cin_true), (0, hcp - hc))).astype(jnp.bfloat16)

    lp = dict(heads=heads, cout=cout, hcp=hcp)
    lp["w_p"] = pad_w(p["w"])
    lp["wres_p"] = pad_w(p["wres"]) if p["wres"] is not None else None
    lp["attl_p"] = jnp.pad(p["attl"].reshape(1, hc), ((0, 0), (0, hcp - hc))).astype(jnp.float32)
    lp["attr_p"] = jnp.pad(p["attr"].reshape(1, hc), ((0, 0), (0, hcp - hc))).astype(jnp.float32)
    lp["bias_p"] = jnp.pad(p["bias"].reshape(1, hc), ((0, 0), (0, hcp - hc))).astype(jnp.float32)
    return lp


def agdn_forward(x, edge_index, params, *, tile_dst=256, tile_src=512, tile_n=256):
    n, cin = x.shape
    max_tile = max(tile_dst, tile_src, tile_n)
    n_pad = _round_up(n, max_tile)
    # v7x has 2 TensorCores: keep >= 2 dst tiles on the "parallel" axis when possible.
    if n_pad // tile_dst < 2 and tile_dst >= 256:
        tile_dst //= 2
    if n_pad // tile_n < 2 and tile_n >= 256:
        tile_n //= 2
    cin_p = _round_up(cin, LANE)

    # Dense 0/1 adjacency (src -> dst), stored int8: half the bf16 N^2 HBM stream.
    src, dst = edge_index[0], edge_index[1]
    has_edge = jnp.zeros((n_pad, n_pad), jnp.bool_).at[dst, src].set(True)
    adj_i8 = has_edge.astype(jnp.int8)

    # Block-sparsity metadata: per dst tile, a compacted (and clamped) list of the
    # non-empty src tiles plus its length.  Shared by all layers.
    nd, ns = n_pad // tile_dst, n_pad // tile_src
    blk = has_edge.reshape(nd, tile_dst, ns, tile_src).any(axis=(1, 3))   # [nd, ns]
    counts = jnp.sum(blk, axis=1).astype(jnp.int32)                      # [nd]
    order = jnp.argsort(jnp.logical_not(blk).astype(jnp.int32),
                        axis=1, stable=True).astype(jnp.int32)            # non-empty first
    jidx = jnp.broadcast_to(jnp.arange(ns, dtype=jnp.int32)[None, :], (nd, ns))
    clamp = jnp.minimum(jidx, jnp.maximum(counts[:, None] - 1, 0))
    order = jnp.take_along_axis(order, clamp, axis=1).reshape(-1)          # flat [nd*ns]

    feat = jnp.pad(x.astype(jnp.float32), ((0, n_pad - n), (0, cin_p - cin)))
    cin_true, cin_pad = cin, cin_p
    for i, p in enumerate(params):
        is_last = (i == len(params) - 1)
        lp = _prepare_layer(p, cin_true, cin_pad)
        feat = agdn_layer(feat, lp, adj_i8, order, counts,
                          apply_elu=not is_last,
                          out_dtype=(jnp.float32 if is_last else jnp.bfloat16),
                          tile_n=tile_n, tile_dst=tile_dst, tile_src=tile_src)
        # inter-layer F.dropout(p=0.0) -> identity
        cin_true, cin_pad = lp["heads"] * lp["cout"], lp["hcp"]

    return feat[:n, :cin_true].astype(jnp.float32)


if __name__ == "__main__":
    key = jax.random.PRNGKey(0)
    k_param, k_x, k_src, k_dst = jax.random.split(key, 4)

    N = 192          # nodes (padded to 256 -> 2x2 attention grid at tile=128)
    E = 512          # random edges (+ N self loops)
    IN_CH, HIDDEN, OUT_CH = 16, 32, 8
    NUM_LAYERS, HEADS = 2, 2

    params = init_agdn_params(k_param, IN_CH, HIDDEN, OUT_CH,
                              num_layers=NUM_LAYERS, heads=HEADS)

    x = jax.random.normal(k_x, (N, IN_CH), jnp.float32)
    src = jax.random.randint(k_src, (E,), 0, N)
    dst = jax.random.randint(k_dst, (E,), 0, N)
    loops = jnp.arange(N)
    edge_index = jnp.stack([jnp.concatenate([src, loops]),
                            jnp.concatenate([dst, loops])])  # [2, E+N]

    out = agdn_forward(x, edge_index, params,
                       tile_dst=128, tile_src=128, tile_n=128)
    out = jax.block_until_ready(out)
    assert out.shape == (N, OUT_CH), out.shape
    assert bool(jnp.all(jnp.isfinite(out)))
    print("KERNEL_OK")
</pallas_src>

<mosaic_0001>
module attributes {stable_mosaic.version = 11 : i64} {
  func.func @_proj_kernel(%arg0: i32, %arg1: memref<128x128xf32, #tpu.memory_space<vmem>>, %arg2: memref<128x128xbf16, #tpu.memory_space<vmem>>, %arg3: memref<1x128xf32, #tpu.memory_space<vmem>>, %arg4: memref<1x128xf32, #tpu.memory_space<vmem>>, %arg5: memref<1x128xf32, #tpu.memory_space<vmem>>, %arg6: memref<128x128xbf16, #tpu.memory_space<vmem>>, %arg7: memref<128x128xbf16, #tpu.memory_space<vmem>>, %arg8: memref<128x128xf32, #tpu.memory_space<vmem>>, %arg9: memref<128x2xf32, #tpu.memory_space<vmem>>, %arg10: memref<128x2xf32, #tpu.memory_space<vmem>>) attributes {dimension_semantics = [#tpu.dimension_semantics<parallel>], iteration_bounds = array<i64: 2>, scalar_prefetch = 0 : i64, scratch_operands = 0 : i64, tpu.core_type = #tpu.core_type<tc>, window_params = [{transform_indices = @transform_0, window_bounds = array<i64: 128, 128>}, {pipeline_mode = #tpu.pipeline_mode<synchronous>, transform_indices = @transform_1, window_bounds = array<i64: 128, 128>}, {pipeline_mode = #tpu.pipeline_mode<synchronous>, transform_indices = @transform_2, window_bounds = array<i64: 1, 128>}, {pipeline_mode = #tpu.pipeline_mode<synchronous>, transform_indices = @transform_3, window_bounds = array<i64: 1, 128>}, {pipeline_mode = #tpu.pipeline_mode<synchronous>, transform_indices = @transform_4, window_bounds = array<i64: 1, 128>}, {pipeline_mode = #tpu.pipeline_mode<synchronous>, transform_indices = @transform_5, window_bounds = array<i64: 128, 128>}, {transform_indices = @transform_6, window_bounds = array<i64: 128, 128>}, {transform_indices = @transform_7, window_bounds = array<i64: 128, 128>}, {transform_indices = @transform_8, window_bounds = array<i64: 128, 2>}, {transform_indices = @transform_9, window_bounds = array<i64: 128, 2>}]} {
    %c0 = arith.constant 0 : index
    %c0_0 = arith.constant 0 : index
    %0 = vector.load %arg1[%c0, %c0_0] : memref<128x128xf32, #tpu.memory_space<vmem>>, vector<128x128xf32>
    %1 = arith.truncf %0 : vector<128x128xf32> to vector<128x128xbf16>
    %c0_1 = arith.constant 0 : index
    %c0_2 = arith.constant 0 : index
    %2 = vector.load %arg2[%c0_1, %c0_2] : memref<128x128xbf16, #tpu.memory_space<vmem>>, vector<128x128xbf16>
    %cst = arith.constant dense<0.000000e+00> : vector<128x128xf32>
    %3 = tpu.matmul %1, %2, %cst {dimension_numbers = #tpu.dot_dimension_numbers<[1], [0], [0], [1], [0, 0, 1, 1], [], []>} : vector<128x128xbf16>, vector<128x128xbf16>, vector<128x128xf32> -> vector<128x128xf32>
    %4 = arith.truncf %3 : vector<128x128xf32> to vector<128x128xbf16>
    %c0_3 = arith.constant 0 : index
    %c0_4 = arith.constant 0 : index
    %5 = vector.load %arg7[%c0_3, %c0_4] : memref<128x128xbf16, #tpu.memory_space<vmem>>, vector<128x128xbf16>
    tpu.vector_store %arg7[%c0_3, %c0_4], %4 {strides = array<i32>} : memref<128x128xbf16, #tpu.memory_space<vmem>>, vector<128x128xbf16>,
    %c0_5 = arith.constant 0 : index
    %c0_6 = arith.constant 0 : index
    %6 = vector.load %arg6[%c0_5, %c0_6] : memref<128x128xbf16, #tpu.memory_space<vmem>>, vector<128x128xbf16>
    %cst_7 = arith.constant dense<0.000000e+00> : vector<128x128xf32>
    %7 = tpu.matmul %1, %6, %cst_7 {dimension_numbers = #tpu.dot_dimension_numbers<[1], [0], [0], [1], [0, 0, 1, 1], [], []>} : vector<128x128xbf16>, vector<128x128xbf16>, vector<128x128xf32> -> vector<128x128xf32>
    %c0_8 = arith.constant 0 : index
    %c0_9 = arith.constant 0 : index
    %8 = vector.load %arg5[%c0_8, %c0_9] : memref<1x128xf32, #tpu.memory_space<vmem>>, vector<1x128xf32>
    %9 = vector.broadcast %8 : vector<1x128xf32> to vector<128x128xf32>
    %10 = arith.addf %7, %9 : vector<128x128xf32>
    %c0_10 = arith.constant 0 : index
    %c0_11 = arith.constant 0 : index
    %11 = vector.load %arg8[%c0_10, %c0_11] : memref<128x128xf32, #tpu.memory_space<vmem>>, vector<128x128xf32>
    tpu.vector_store %arg8[%c0_10, %c0_11], %10 {strides = array<i32>} : memref<128x128xf32, #tpu.memory_space<vmem>>, vector<128x128xf32>,
    %c0_12 = arith.constant 0 : index
    %c0_13 = arith.constant 0 : index
    %12 = vector.load %arg3[%c0_12, %c0_13] : memref<1x128xf32, #tpu.memory_space<vmem>>, vector<1x128xf32>
    %c0_14 = arith.constant 0 : index
    %c0_15 = arith.constant 0 : index
    %13 = vector.load %arg4[%c0_14, %c0_15] : memref<1x128xf32, #tpu.memory_space<vmem>>, vector<1x128xf32>
    %14 = vector.broadcast %12 : vector<1x128xf32> to vector<128x128xf32>
    %15 = arith.mulf %3, %14 : vector<128x128xf32>
    %16 = vector.broadcast %13 : vector<1x128xf32> to vector<128x128xf32>
    %17 = arith.mulf %3, %16 : vector<128x128xf32>
    %18 = tpu.iota {dimensions = array<i32: 1>} : vector<1x128xi32>
    %c0_i32 = arith.constant 0 : i32
    %19 = vector.broadcast %c0_i32 : i32 to vector<1x128xi32>
    %20 = arith.cmpi sge, %18, %19 : vector<1x128xi32>
    %c32_i32 = arith.constant 32 : i32
    %21 = vector.broadcast %c32_i32 : i32 to vector<1x128xi32>
    %22 = arith.cmpi slt, %18, %21 : vector<1x128xi32>
    %23 = arith.andi %20, %22 : vector<1x128xi1>
    %cst_16 = arith.constant 0.000000e+00 : f32
    %24 = vector.shape_cast %23 : vector<1x128xi1> to vector<1x128xi1>
    %25 = vector.broadcast %24 : vector<1x128xi1> to vector<128x128xi1>
    %26 = vector.broadcast %cst_16 : f32 to vector<128x128xf32>
    %27 = arith.select %25, %15, %26 : vector<128x128xi1>, vector<128x128xf32>
    %cst_17 = arith.constant dense<0.000000e+00> : vector<128xf32>
    %28 = vector.multi_reduction <add>, %27, %cst_17 [1] : vector<128x128xf32> to vector<128xf32>
    %29 = vector.shape_cast %28 : vector<128xf32> to vector<128x1xf32>
    %cst_18 = arith.constant 0.000000e+00 : f32
    %30 = vector.shape_cast %23 : vector<1x128xi1> to vector<1x128xi1>
    %31 = vector.broadcast %30 : vector<1x128xi1> to vector<128x128xi1>
    %32 = vector.broadcast %cst_18 : f32 to vector<128x128xf32>
    %33 = arith.select %31, %17, %32 : vector<128x128xi1>, vector<128x128xf32>
    %cst_19 = arith.constant dense<0.000000e+00> : vector<128xf32>
    %34 = vector.multi_reduction <add>, %33, %cst_19 [1] : vector<128x128xf32> to vector<128xf32>
    %35 = vector.shape_cast %34 : vector<128xf32> to vector<128x1xf32>
    %c32_i32_20 = arith.constant 32 : i32
    %36 = vector.broadcast %c32_i32_20 : i32 to vector<1x128xi32>
    %37 = arith.cmpi sge, %18, %36 : vector<1x128xi32>
    %c64_i32 = arith.constant 64 : i32
    %38 = vector.broadcast %c64_i32 : i32 to vector<1x128xi32>
    %39 = arith.cmpi slt, %18, %38 : vector<1x128xi32>
    %40 = arith.andi %37, %39 : vector<1x128xi1>
    %cst_21 = arith.constant 0.000000e+00 : f32
    %41 = vector.shape_cast %40 : vector<1x128xi1> to vector<1x128xi1>
    %42 = vector.broadcast %41 : vector<1x128xi1> to vector<128x128xi1>
    %43 = vector.broadcast %cst_21 : f32 to vector<128x128xf32>
    %44 = arith.select %42, %15, %43 : vector<128x128xi1>, vector<128x128xf32>
    %cst_22 = arith.constant dense<0.000000e+00> : vector<128xf32>
    %45 = vector.multi_reduction <add>, %44, %cst_22 [1] : vector<128x128xf32> to vector<128xf32>
    %46 = vector.shape_cast %45 : vector<128xf32> to vector<128x1xf32>
    %cst_23 = arith.constant 0.000000e+00 : f32
    %47 = vector.shape_cast %40 : vector<1x128xi1> to vector<1x128xi1>
    %48 = vector.broadcast %47 : vector<1x128xi1> to vector<128x128xi1>
    %49 = vector.broadcast %cst_23 : f32 to vector<128x128xf32>
    %50 = arith.select %48, %17, %49 : vector<128x128xi1>, vector<128x128xf32>
    %cst_24 = arith.constant dense<0.000000e+00> : vector<128xf32>
    %51 = vector.multi_reduction <add>, %50, %cst_24 [1] : vector<128x128xf32> to vector<128xf32>
    %52 = vector.shape_cast %51 : vector<128xf32> to vector<128x1xf32>
    %53 = tpu.concatenate %29, %46 in 1 : vector<128x1xf32>, vector<128x1xf32> -> vector<128x2xf32>
    %c0_25 = arith.constant 0 : index
    %c0_26 = arith.constant 0 : index
    %54 = vector.load %arg9[%c0_25, %c0_26] : memref<128x2xf32, #tpu.memory_space<vmem>>, vector<128x2xf32>
    tpu.vector_store %arg9[%c0_25, %c0_26], %53 {strides = array<i32>} : memref<128x2xf32, #tpu.memory_space<vmem>>, vector<128x2xf32>,
    %55 = tpu.concatenate %35, %52 in 1 : vector<128x1xf32>, vector<128x1xf32> -> vector<128x2xf32>
    %c0_27 = arith.constant 0 : index
    %c0_28 = arith.constant 0 : index
    %56 = vector.load %arg10[%c0_27, %c0_28] : memref<128x2xf32, #tpu.memory_space<vmem>>, vector<128x2xf32>
    tpu.vector_store %arg10[%c0_27, %c0_28], %55 {strides = array<i32>} : memref<128x2xf32, #tpu.memory_space<vmem>>, vector<128x2xf32>,
    return
  }
  func.func @transform_0(%arg0: i32) -> (i32, i32) {
    %c0_i32 = arith.constant 0 : i32
    %c0_i32_0 = arith.constant 0 : i32
    return %arg0, %c0_i32 : i32, i32
  }
  func.func @transform_1(%arg0: i32) -> (i32, i32) {
    %c0_i32 = arith.constant 0 : i32
    %c0_i32_0 = arith.constant 0 : i32
    %c0_i32_1 = arith.constant 0 : i32
    return %c0_i32, %c0_i32_0 : i32, i32
  }
  func.func @transform_2(%arg0: i32) -> (i32, i32) {
    %c0_i32 = arith.constant 0 : i32
    %c0_i32_0 = arith.constant 0 : i32
    %c0_i32_1 = arith.constant 0 : i32
    return %c0_i32, %c0_i32_0 : i32, i32
  }
  func.func @transform_3(%arg0: i32) -> (i32, i32) {
    %c0_i32 = arith.constant 0 : i32
    %c0_i32_0 = arith.constant 0 : i32
    %c0_i32_1 = arith.constant 0 : i32
    return %c0_i32, %c0_i32_0 : i32, i32
  }
  func.func @transform_4(%arg0: i32) -> (i32, i32) {
    %c0_i32 = arith.constant 0 : i32
    %c0_i32_0 = arith.constant 0 : i32
    %c0_i32_1 = arith.constant 0 : i32
    return %c0_i32, %c0_i32_0 : i32, i32
  }
  func.func @transform_5(%arg0: i32) -> (i32, i32) {
    %c0_i32 = arith.constant 0 : i32
    %c0_i32_0 = arith.constant 0 : i32
    %c0_i32_1 = arith.constant 0 : i32
    return %c0_i32, %c0_i32_0 : i32, i32
  }
  func.func @transform_6(%arg0: i32) -> (i32, i32) {
    %c0_i32 = arith.constant 0 : i32
    %c0_i32_0 = arith.constant 0 : i32
    return %arg0, %c0_i32 : i32, i32
  }
  func.func @transform_7(%arg0: i32) -> (i32, i32) {
    %c0_i32 = arith.constant 0 : i32
    %c0_i32_0 = arith.constant 0 : i32
    return %arg0, %c0_i32 : i32, i32
  }
  func.func @transform_8(%arg0: i32) -> (i32, i32) {
    %c0_i32 = arith.constant 0 : i32
    %c0_i32_0 = arith.constant 0 : i32
    return %arg0, %c0_i32 : i32, i32
  }
  func.func @transform_9(%arg0: i32) -> (i32, i32) {
    %c0_i32 = arith.constant 0 : i32
    %c0_i32_0 = arith.constant 0 : i32
    return %arg0, %c0_i32 : i32, i32
  }
}

</mosaic_0001>

<bundles_post_ra>
// kernel: tpu_custom_call.1
= control target key start
LH: loop header
LB: loop body
LE: loop exit
PB: predicated region body
PF: predicated region fallthrough
CT: control target
= control target key end

     0   :  { %s2766_s0 = inlined_call_operand.hbm [shape: f32[256,128], index: 0, kind: input, shape index: {}]   ;;  %s2767_s1 = inlined_call_operand.hbm [shape: bf16[128,128], index: 1, kind: input, shape index: {}]   ;;  %s2768_s2 = inlined_call_operand.vmem [shape: f32[1,128], index: 2, kind: input, shape index: {}]   ;;  %s2769_s3 = inlined_call_operand.vmem [shape: f32[1,128], index: 3, kind: input, shape index: {}]   ;;  %s2770_s4 = inlined_call_operand.vmem [shape: f32[1,128], index: 4, kind: input, shape index: {}]   ;;  %s2771_s5 = inlined_call_operand.hbm [shape: bf16[128,128], index: 5, kind: input, shape index: {}]   ;;  %s2772_s6 = inlined_call_operand.hbm [shape: bf16[256,128], index: 6, kind: output, shape index: {0}]   ;;  %s2773_s7 = inlined_call_operand.hbm [shape: f32[256,128], index: 7, kind: output, shape index: {1}]   ;;  %s2774_s8 = inlined_call_operand.vmem [shape: f32[256,2], index: 8, kind: output, shape index: {2}]   ;;  %s2775_s9 = inlined_call_operand.vmem [shape: f32[256,2], index: 9, kind: output, shape index: {3}]  }
   0x1   :  { %2781 = sst [smem:[#allocation16_spill]] %s2767_s1 }
   0x2   :  { %2782 = sst [smem:[#allocation17_spill]] %s2771_s5 }
   0x3   :  { %15 = vsyncpa [#allocation3], 0 }
   0x4   :  { %17 = vsyncpa [#allocation3 + $0x1], 0 }
   0x5   :  { %18 = vsyncpa [#allocation6], 0 }
   0x6   :  { %19 = vsyncpa [#allocation4], 0 }
   0x7   :  { %21 = vsyncpa [#allocation4 + $0x1], 0 }
   0x8   :  { %22 = vsyncpa [#allocation10], 0 }
   0x9   :  { %24 = vsyncpa [#allocation10 + $0x1], 0  ;;  %s1975_s30 = smov 0   ;;  %s1977_s10 = smov 0  }
   0xa   :  { %s1979_s11 = smov 0   ;;  %s1981_s12 = smov 0  }
   0xb LB: > { %s1996_s13 = sadd.s32 4294967295, %s1910_s12   ;;  %s1413_s14 = sadd.s32 4294967294, %s1910_s12   ;;  %s1910_s12 = sphi %s1981_s12, %s2811_s12   ;;  %s1906_s11 = sphi %s1979_s11, %s2810_s11   ;;  %s1902_s10 = sphi %s1977_s10, %s2809_s10   ;;  %s1898_s30 = sphi %s1975_s30, %s2808_s30  }
   0xc   : > { %p50_p0 = scmp.ne.s32.totalorder %s1902_s10, %s1898_s30  ;;  %p2776_p1 = scmp.eq.s32.totalorder %s1996_s13, 0 }
   0xd   : > { %p185_p3 = scmp.eq.s32.totalorder %s1413_s14, 1  ;;  %p1414_p5 = scmp.ge.s32.totalorder %s1910_s12, 1 }
   0xe   : > { %p2005_p4 = por %p2776_p1, %p50_p0  ;;  %p270_p7 = scmp.lt.s32.totalorder %s1910_s12, 3 }
   0xf   : > { %p2010_p6 = por %p185_p3, %p50_p0  ;;  %s1912_s18 = smov [#allocation5]  }
  0x10   : > { %s2783_s15 = scalar_select %p2005_p4, 1, 0 }
  0x11   : > { %s2784_s16 = scalar_select %p2010_p6, 1, 0 }
  0x12   : > { %p2015_p8 = pnand %p1414_p5, %p270_p7  ;;  %s282_s19 = sshll.u32 %s1912_s18, 4  ;;  %s283_s19 = int_to_ptr.vmem [resolvable:$true] %s282_s19 }
  0x13   : > { %s1913_s21 = smov [#allocation7]   ;;  %s1743_s23 = scalar_lea.vmem %s283_s19, 1024 }
  0x14   : > { %s2785_s17 = scalar_select %p2015_p8, 1, 0 }
  0x15   : > { %p1650_p9 = pneg %p2015_p8  ;;  %s304_s22 = sshll.u32 %s1913_s21, 4  ;;  %s305_s22 = int_to_ptr.vmem [resolvable:$true] %s304_s22 }
  0x16   : > { %p1744_p13 = scmp.ne.s32.totalorder %s283_s19, %s1743_s23  ;;  %p1751_p5 = scmp.lt.s32.totalorder %s283_s19, %s283_s19 }
  0x17   : > { %p2024_p11 = pnand %p1650_p9, %p2776_p1  ;;  %p1752_p7 = scmp.lt.s32.totalorder %s1743_s23, %s1743_s23 }
  0x19   : > { %p1734_p12 = pneg %p2024_p11  ;;  %p1753_p10 = por %p1752_p7, %p1751_p5 }
  0x1b   : > { %p1746_p0 = pnand %p1744_p13, %p1734_p12 }
  0x1d   : > { %p1747_p3 = pneg %p1746_p0 }
  0x1f   : > { %p1754_p9 = pnand %p1753_p10, %p1747_p3 }
  0x21   : > { %1757 = shalt.err (!%p1754_p9)
}
  0x22   : > { %s1914_s24 = smov 64   ;;  %s1915_s25 = smov 4  }
  0x23   : > { %s2787_s1 = sld [smem:[#allocation16_spill]]  ;;  %s1769_s28 = scalar_lea.vmem %s305_s22, 1024 }
  0x24   : > { %p1770_p1 = scmp.ne.s32.totalorder %s305_s22, %s1769_s28  ;;  %p1777_p2 = scmp.lt.s32.totalorder %s305_s22, %s305_s22 }
  0x25   : > { %p1778_p6 = scmp.lt.s32.totalorder %s1769_s28, %s1769_s28 }
  0x26   : > { %p1772_p13 = pnand %p1770_p1, %p1734_p12 }
  0x27   : > { %p1779_p5 = por %p1778_p6, %p1777_p2 }
  0x28   : > { %p1773_p0 = pneg %p1772_p13 }
  0x29   : > { %1653 = dma.hbm_to_vmem [thread:$0]  (!%p2024_p11), %s2787_s1, 1024, %s283_s19, [#allocation6], %s1914_s24, %s1914_s24, %s1915_s25  }
  0x2a   : > { %p1780_p10 = pnand %p1779_p5, %p1773_p0 }
  0x2c   : > { %1783 = shalt.err (!%p1780_p10)
}
  0x2d   : > { %s2788_s5 = sld [smem:[#allocation17_spill]]  ;;  %s2047_s18 = sadd.s32 1, %s1910_s12  }
  0x2e   : > { %s37_s19 = sadd.s32 1, %s1906_s11  ;;  %s34_s20 = ssub.s32 %s1910_s12, %s2047_s18 }
  0x2f   : > { %p44_p1 = scmp.ne.s32.totalorder %s1906_s11, %s1902_s10  ;;  %p35_p2 = scmp.eq.s32.totalorder %s34_s20, 0 }
  0x30   : > { %p45_p6 = scmp.eq.s32.totalorder %s1910_s12, 0  ;;  %p2789_p12 = scmp.eq.s32.totalorder %s1996_s13, 1 }
  0x31   : > { %p1670_p7 = scmp.lt.s32.totalorder %s1910_s12, 2  ;;  %s318_s26 = sand.u32 1, %s1906_s11  }
  0x32   : > { %p2057_p3 = por %p2789_p12, %p44_p1  ;;  %p46_p9 = por %p45_p6, %p44_p1 }
  0x33   : > { %1656 = dma.hbm_to_vmem [thread:$0]  (!%p2024_p11), %s2788_s5, 1024, %s305_s22, [#allocation6], %s1914_s24, %s1914_s24, %s1915_s25  }
  0x34   : > { %s2790_s21 = scalar_select %p2057_p3, 1, 0 }
  0x35   : > { %s2063_s23 = scalar_select %p35_p2, %s1906_s11, %s37_s19  }
  0x36   : > { %s1418_s27 = sshll.u32 %s318_s26, 7  ;;  %s1474_s22 = sshll.u32 %s1910_s12, 11 }
  0x37   : > { %2791 = sst [smem:[#allocation15_spill]] %s2063_s23  ;;  %s2070_s28 = scalar_lea.hbm %s2766_s0, %s1474_s22 }
  0x38   : > { %s322_s29 = scalar_lea.vmem [#allocation2], %s1418_s27  ;;  %p2074_p11 = pnand %p1670_p7, %p46_p9 }
  0x39   : > { %s329_s14 = sshll.u32 %s322_s29, 4  ;;  %s2078_s19 = scalar_lea.sflag [#allocation3], %s318_s26  ;;  %s2072_s14 = int_to_ptr.vmem [resolvable:$true] %s329_s14 }
  0x3a   : > { %s1784_s1 = scalar_lea.hbm %s2070_s28, 2048  ;;  %p1786_p0 = pneg %p2074_p11 }
  0x3b   : > { %p1785_p13 = scmp.ne.s32.totalorder %s2070_s28, %s1784_s1  ;;  %s1789_s27 = scalar_lea.hbm %s2766_s0, 4096 }
  0x3c   : > { %p1790_p1 = scmp.lt.s32.totalorder %s2070_s28, %s2766_s0  ;;  %p1791_p2 = scmp.lt.s32.totalorder %s1789_s27, %s1784_s1 }
  0x3d   : > { %p1787_p5 = pnand %p1786_p0, %p1785_p13 }
  0x3e   : > { %p1792_p6 = por %p1791_p2, %p1790_p1 }
  0x3f   : > { %p1788_p10 = pneg %p1787_p5 }
  0x41   : > { %p1793_p12 = pnand %p1792_p6, %p1788_p10 }
  0x43   : > { %1796 = shalt.err (!%p1793_p12)
}
  0x44   : > { %s1797_s26 = scalar_lea.vmem %s2072_s14, 2048  ;;  %s1916_s5 = smov [#allocation2]  }
  0x45   : > { %p1798_p7 = scmp.ne.s32.totalorder %s2072_s14, %s1797_s26  ;;  %s1802_s23 = sshll.u32 %s1916_s5, 4  ;;  %s1803_s23 = int_to_ptr.vmem [resolvable:$false] %s1802_s23 }
  0x46   : > { %s1804_s22 = scalar_lea.vmem %s1803_s23, 4096  ;;  %p1805_p5 = scmp.lt.s32.totalorder %s2072_s14, %s1803_s23 }
  0x47   : > { %p1800_p9 = pnand %p1798_p7, %p1786_p0  ;;  %p1806_p3 = scmp.lt.s32.totalorder %s1804_s22, %s1797_s26 }
  0x49   : > { %p1801_p13 = pneg %p1800_p9  ;;  %p1807_p4 = por %p1806_p3, %p1805_p5 }
  0x4b   : > { %p1808_p8 = pnand %p1807_p4, %p1801_p13 }
  0x4d   : > { %1811 = shalt.err (!%p1808_p8)
}
  0x4e   : > { %s1917_s1 = smov 128   ;;  %s1918_s24 = smov 8  }
  0x4f   : > { %1660 = dma.hbm_to_vmem [thread:$0]  (!%p2074_p11), %s2070_s28, 2048, %s2072_s14, %s2078_s19, %s1917_s1, %s1917_s1, %s1918_s24  }
  0x50   : > { %p2793_p0 = scmp.ne.s32.totalorder %s2785_s17, 0 }
  0x51   : > { %s2102_s5 = sand.u32 (!%p2793_p0), 1, %s1902_s10   ;;  %p2794_p4 = scmp.ne.s32.totalorder (!%p2793_p0), %s2783_s15, 0 }
  0x52   : > { %341 = sbr.rel (%p2793_p0) target bundleno = 613 (0x265), region = 44  ;;  %s1422_s23 = sshll.u32 (!%p2793_p0), %s2102_s5, 7 }
  0x53   : > { %s344_s27 = scalar_lea.sflag (!%p2793_p0), [#allocation3], %s2102_s5  ;;  %s2108_s25 = scalar_lea.vmem (!%p2793_p0), [#allocation2], %s1422_s23 }
  0x57   : > { %1881 = dma.done.wait (%p2794_p4), %s344_s27, 2048  }
  0x58   : > { %1883 = vsyncadd (%p2794_p4), %s344_s27, 4294965248  ;;  %p2795_p8 = scmp.eq.s32.totalorder %s1996_s13, 0 }
  0x5a   : > { %1885 = dma.done.wait (%p2795_p8), [#allocation6], 2048   ;;  %p2796_p3 = pmov %p2795_p8 }
  0x5b   : > { %v1716_v0 = vld [vmem:[#allocation5 + $0x38] sm:$0xff]   ;;  %v1717_v1 = vld [vmem:[#allocation5 + $0x30] sm:$0xff]   ;;  %v1718_v2 = vld [vmem:[#allocation5 + $0x28] sm:$0xff]   ;;  %v916_v40 = vlaneseq  ;;  %s1425_s20 = sshll.u32 %s2102_s5, 6  ;;  %s2494_s22 = scalar_lea.vmem [#allocation9], %s1422_s23 }
  0x5c   : > { %1887 = vsyncadd (%p2796_p3), [#allocation6], 4294965248  ;;  %1572 = vmatprep.subr.bf16.mxu0 %v1716_v0  ;;  %v1719_v3 = vld [vmem:[#allocation5 + $0x20] sm:$0xff]   ;;  %v422_v5 = vld [vmem:[%s2108_s25 + $0x8] sm:$0xff]  ;;  %s2161_s19 = scalar_lea.vmem [#allocation8], %s1425_s20  ;;  %s1427_s1 = sshll.u32 %s1996_s13, 4 }
  0x5d   : > { %1573 = vmatpush3.bf16.msra.mxu0 %v1716_v0  ;;  %v421_v4 = vld [vmem:[%s2108_s25] sm:$0xff]  ;;  %v1720_v7 = vld [vmem:[#allocation5 + $0x18] sm:$0xff]   ;;  %v1721_v8 = vld [vmem:[#allocation5 + $0x10] sm:$0xff]   ;;  %v2134_v41 = vand.u32 127, %v916_v40  ;;  %p409_p11 = scmp.lt.s32.totalorder %s1427_s1, 31  ;;  %s1215_s23 = sshll.u32 %s2161_s19, 4  ;;  %s2584_s23 = int_to_ptr.vmem [resolvable:$true] %s1215_s23 }
  0x5e   : > { %1574 = vmatprep.subr.bf16.mxu0 %v1717_v1  ;;  %v437_v6 = vpack.c.bf16 %v422_v5, %v421_v4  ;;  %v1722_v9 = vld [vmem:[#allocation5 + $0x8] sm:$0xff]   ;;  %v1723_v10 = vld [vmem:[#allocation5] sm:$0xff]   ;;  %v423_v11 = vld [vmem:[%s2108_s25 + $0x10] sm:$0xff]  ;;  %s1491_s17 = sshll.u32 %s1996_s13, 10  ;;  %s1812_s26 = scalar_lea.vmem %s2584_s23, 1024 }
  0x5f   : > { %v424_v12 = vld [vmem:[%s2108_s25 + $0x18] sm:$0xff]  ;;  %v425_v13 = vld [vmem:[%s2108_s25 + $0x20] sm:$0xff]  ;;  %v426_v14 = vld [vmem:[%s2108_s25 + $0x28] sm:$0xff]  ;;  %vm919_vm0 = vcmp.lt.s32.totalorder %v2134_v41, 32  ;;  %vm1019_vm1 = vcmp.ge.s32.totalorder %v2134_v41, 32  ;;  %vm1020_vm2 = vcmp.lt.s32.totalorder %v2134_v41, 64  ;;  %s2582_s29 = scalar_lea.hbm %s2772_s6, %s1491_s17  ;;  %p1813_p10 = scmp.ne.s32.totalorder %s2584_s23, %s1812_s26 }
  0x60   : > { %1588 = vmatprep.mubr.bf16.mxu0 %v437_v6  ;;  %1620 = vmatprep.mubr.bf16.mxu1 %v437_v6  ;;  %v438_v15 = vpack.c.bf16 %v424_v12, %v423_v11  ;;  %v439_v16 = vpack.c.bf16 %v426_v14, %v425_v13  ;;  %v427_v17 = vld [vmem:[%s2108_s25 + $0x30] sm:$0xff]  ;;  %v428_v18 = vld [vmem:[%s2108_s25 + $0x38] sm:$0xff]  ;;  %v429_v19 = vld [vmem:[%s2108_s25 + $0x40] sm:$0xff]  ;;  %s2813_s1 = smov (!%p409_p11, %s1427_s1), 31  ;;  %p2801_p1 = scmp.ne.s32.totalorder %s2790_s21, 0 }
  0x61   : > { %1575 = vmatpush3.bf16.msra.mxu0 %v1717_v1  ;;  %v430_v20 = vld [vmem:[%s2108_s25 + $0x48] sm:$0xff]  ;;  %v440_v21 = vpack.c.bf16 %v428_v18, %v427_v17  ;;  %v431_v23 = vld [vmem:[%s2108_s25 + $0x50] sm:$0xff]  ;;  %v432_v24 = vld [vmem:[%s2108_s25 + $0x58] sm:$0xff]  ;;  %s2780_s24 = sshll.u32 %s2813_s1, 3  ;;  %s1919_s27 = smov [#allocation8]  }
  0x62   : > { %1576 = vmatprep.subr.bf16.mxu0 %v1718_v2  ;;  %v441_v22 = vpack.c.bf16 %v430_v20, %v429_v19  ;;  %v433_v25 = vld [vmem:[%s2108_s25 + $0x60] sm:$0xff]  ;;  %v434_v26 = vld [vmem:[%s2108_s25 + $0x68] sm:$0xff]  ;;  %v442_v27 = vpack.c.bf16 %v432_v24, %v431_v23  ;;  %v435_v29 = vld [vmem:[%s2108_s25 + $0x70] sm:$0xff]  ;;  %s2575_s15 = scalar_lea.vmem %s2774_s8, %s2780_s24  ;;  %p1814_p2 = pnand %p1813_p10, %p2801_p1 }
  0x63   : > { %v443_v28 = vpack.c.bf16 %v434_v26, %v433_v25  ;;  %v436_v30 = vld [vmem:[%s2108_s25 + $0x78] sm:$0xff]  ;;  %v1725_v33 = vld [vmem:[#allocation7 + $0x30] sm:$0xff]   ;;  %v1726_v34 = vld [vmem:[#allocation7 + $0x28] sm:$0xff]   ;;  %s1816_s25 = sshll.u32 %s1919_s27, 4  ;;  %s1817_s25 = int_to_ptr.vmem [resolvable:$false] %s1816_s25 }
  0x64   : > { %v444_v31 = vpack.c.bf16 %v436_v30, %v435_v29  ;;  %v1724_v32 = vld [vmem:[#allocation7 + $0x38] sm:$0xff]   ;;  %v1727_v35 = vld [vmem:[#allocation7 + $0x20] sm:$0xff]   ;;  %v1729_v37 = vld [vmem:[#allocation7 + $0x10] sm:$0xff]   ;;  %p1815_p6 = pneg %p1814_p2  ;;  %s1818_s14 = scalar_lea.vmem %s1817_s25, 2048 }
  0x65   : > { %1577 = vmatpush3.bf16.msra.mxu0 %v1718_v2  ;;  %1604 = vmatprep.subr.bf16.mxu1 %v1724_v32  ;;  %v1728_v36 = vld [vmem:[#allocation7 + $0x18] sm:$0xff]   ;;  %v1730_v38 = vld [vmem:[#allocation7 + $0x8] sm:$0xff]   ;;  %v1731_v39 = vld [vmem:[#allocation7] sm:$0xff]   ;;  %p1819_p12 = scmp.lt.s32.totalorder %s2584_s23, %s1817_s25  ;;  %p1820_p7 = scmp.lt.s32.totalorder %s1818_s14, %s1812_s26 }
  0x66   : > { %1578 = vmatprep.subr.bf16.mxu0 %v1719_v3  ;;  %1605 = vmatpush3.bf16.msra.mxu1 %v1724_v32  ;;  %v2139_v42 = vld [vmem:[%s2769_s3] ss:$0 sm:$0xff]  ;;  %vm2156_vm3 = vmand %vm1019_vm1, %vm1020_vm2 }
  0x67   : > { %1606 = vmatprep.subr.bf16.mxu1 %v1725_v33  ;;  %v2144_v43 = vld [vmem:[%s2768_s2] ss:$0 sm:$0xff]  ;;  %p1821_p9 = por %p1820_p7, %p1819_p12 }
  0x68   : > { %v2487_v41 = vld [vmem:[%s2770_s4] ss:$0 sm:$0xff] }
  0x69   : > { %1579 = vmatpush3.bf16.msra.mxu0 %v1719_v3  ;;  %p1822_p13 = pnand %p1821_p9, %p1815_p6 }
  0x6a   : > { %1580 = vmatprep.subr.bf16.mxu0 %v1720_v7  ;;  %1607 = vmatpush3.bf16.msra.mxu1 %v1725_v33 }
  0x6b   : > { %1608 = vmatprep.subr.bf16.mxu1 %v1726_v34 }
  0x6d   : > { %1581 = vmatpush3.bf16.msra.mxu0 %v1720_v7 }
  0x6e   : > { %1582 = vmatprep.subr.bf16.mxu0 %v1721_v8  ;;  %1609 = vmatpush3.bf16.msra.mxu1 %v1726_v34 }
  0x6f   : > { %1610 = vmatprep.subr.bf16.mxu1 %v1727_v35 }
  0x71   : > { %1583 = vmatpush3.bf16.msra.mxu0 %v1721_v8 }
  0x72   : > { %1584 = vmatprep.subr.bf16.mxu0 %v1722_v9  ;;  %1611 = vmatpush3.bf16.msra.mxu1 %v1727_v35 }
  0x73   : > { %1612 = vmatprep.subr.bf16.mxu1 %v1728_v36 }
  0x75   : > { %1585 = vmatpush3.bf16.msra.mxu0 %v1722_v9 }
  0x76   : > { %1586 = vmatprep.subr.bf16.mxu0 %v1723_v10  ;;  %1613 = vmatpush3.bf16.msra.mxu1 %v1728_v36 }
  0x77   : > { %1614 = vmatprep.subr.bf16.mxu1 %v1729_v37 }
  0x79   : > { %1587 = vmatpush3.bf16.msra.mxu0 %v1723_v10 }
  0x7a   : > { %1615 = vmatpush3.bf16.msra.mxu1 %v1729_v37 }
  0x7b   : > { %1616 = vmatprep.subr.bf16.mxu1 %v1730_v38 }
  0x7c   : > { %1589 = vmatmul.mubr.bf16.vlgmr.msra.gmra.mxu0 %v438_v15 }
  0x7d   : > { %1592 = vmatprep.mubr.bf16.mxu0 %v439_v16 }
  0x7e   : > { %1617 = vmatpush3.bf16.msra.mxu1 %v1730_v38 }
  0x7f   : > { %1618 = vmatprep.subr.bf16.mxu1 %v1731_v39 }
  0x82   : > { %1619 = vmatpush3.bf16.msra.mxu1 %v1731_v39 }
  0x84   : > { %1593 = vmatmul.mubr.bf16.gmra.mxu0 %v440_v21 }
  0x85   : > { %1596 = vmatprep.mubr.bf16.mxu0 %v441_v22  ;;  %1621 = vmatmul.mubr.bf16.vlgmr.msra.gmra.mxu1 %v438_v15 }
  0x86   : > { %1624 = vmatprep.mubr.bf16.mxu1 %v439_v16 }
  0x8c   : > { %1597 = vmatmul.mubr.bf16.gmra.mxu0 %v442_v27 }
  0x8d   : > { %1600 = vmatprep.mubr.bf16.mxu0 %v443_v28  ;;  %1625 = vmatmul.mubr.bf16.gmra.mxu1 %v440_v21 }
  0x8e   : > { %1628 = vmatprep.mubr.bf16.mxu1 %v441_v22 }
  0x94   : > { %1601 = vmatmul.mubr.bf16.gmra.mxu0 %v444_v31 }
  0x95   : > { %1629 = vmatmul.mubr.bf16.gmra.mxu1 %v442_v27 }
  0x96   : > { %1632 = vmatprep.mubr.bf16.mxu1 %v443_v28 }
  0x9d   : > { %1633 = vmatmul.mubr.bf16.gmra.mxu1 %v444_v31 }
 0x13c   : > { %v1590_v44 = vpop.f32.mrf.mxu0 }
 0x13d   : > { %v902_v45 = vmul.f32 %v1590_v44, %v2139_v42  ;;  %v880_v46 = vmul.f32 %v1590_v44, %v2144_v43 }
 0x13e   : > { %v543_v47 = vpop.f32.mrf.mxu0 }
 0x13f   : > { %v973_v48 = vsel %vm919_vm0, %v902_v45, 0.0  ;;  %v925_v49 = vsel %vm919_vm0, %v880_v46, 0.0  ;;  %v1026_v56 = vsel %vm2156_vm3, %v880_v46, 0.0  ;;  %v1074_v61 = vsel %vm2156_vm3, %v902_v45, 0.0 }
 0x140   : > { %991 = vadd.xlane.f32.xlu0 %v973_v48  ;;  %943 = vadd.xlane.f32.xlu1 %v925_v49  ;;  %v1591_v50 = vpop.f32.mrf.mxu0  ;;  %v878_v63 = vmul.f32 %v2144_v43, %v543_v47  ;;  %v900_v2 = vmul.f32 %v2139_v42, %v543_v47 }
 0x141   : > { %v1501_v52 = vpack.c.bf16 %v1591_v50, %v1590_v44  ;;  %v881_v53 = vmul.f32 %v1591_v50, %v2144_v43  ;;  %v903_v58 = vmul.f32 %v1591_v50, %v2139_v42 }
 0x142   : > { %v546_v54 = vpop.f32.mrf.mxu0  ;;  %v923_v4 = vsel %vm919_vm0, %v878_v63, 0.0  ;;  %v971_v11 = vsel %vm919_vm0, %v900_v2, 0.0  ;;  %v1024_v18 = vsel %vm2156_vm3, %v878_v63, 0.0  ;;  %v1072_v36 = vsel %vm2156_vm3, %v900_v2, 0.0 }
 0x143   : > { %1533 = vst [vmem:[%s2161_s19 + $0x8] sm:$0xff] %v1501_v52   ;;  %v1496_v55 = vpack.c.bf16 %v546_v54, %v543_v47  ;;  %v926_v57 = vsel %vm919_vm0, %v881_v53, 0.0  ;;  %v974_v62 = vsel %vm919_vm0, %v903_v58, 0.0  ;;  %v1027_v5 = vsel %vm2156_vm3, %v881_v53, 0.0 }
 0x144   : > { %1044 = vadd.xlane.f32.xlu0 %v1026_v56  ;;  %945 = vadd.xlane.f32.xlu1 %v926_v57  ;;  %v2169_v59 = vpop.f32.mrf.mxu0  ;;  %v2194_v8 = vmul.f32 %v2139_v42, %v546_v54  ;;  %v1075_v12 = vsel %vm2156_vm3, %v903_v58, 0.0  ;;  %v879_v19 = vmul.f32 %v2144_v43, %v546_v54 }
 0x145   : > { %1497 = vst [vmem:[%s2161_s19] sm:$0xff] %v1496_v55   ;;  %v884_v45 = vmul.f32 %v2169_v59, %v2144_v43 }
 0x146   : > { %v2172_v60 = vpop.f32.mrf.mxu0  ;;  %v972_v23 = vsel %vm919_vm0, %v2194_v8, 0.0  ;;  %v1025_v44 = vsel %vm2156_vm3, %v879_v19, 0.0  ;;  %v1073_v58 = vsel %vm2156_vm3, %v2194_v8, 0.0 }
 0x148   : > { %1092 = vadd.xlane.f32.xlu0 %v1074_v61  ;;  %993 = vadd.xlane.f32.xlu1 %v974_v62  ;;  %v2179_v0 = vpop.f32.mrf.mxu0  ;;  %v924_v61 = vsel %vm919_vm0, %v879_v19, 0.0 }
 0x149   : > { %v1511_v1 = vpack.c.bf16 %v2179_v0, %v2169_v59 }
 0x14a   : > { %v2184_v3 = vpop.f32.mrf.mxu0 }
 0x14b   : > { %1535 = vst [vmem:[%s2161_s19 + $0x18] sm:$0xff] %v1511_v1   ;;  %v1506_v6 = vpack.c.bf16 %v2184_v3, %v2172_v60 }
 0x14c   : > { %939 = vadd.xlane.f32.xlu0 %v923_v4  ;;  %1046 = vadd.xlane.f32.xlu1 %v1027_v5  ;;  %v1598_v7 = vpop.f32.mrf.mxu0 }
 0x14d   : > { %1534 = vst [vmem:[%s2161_s19 + $0x10] sm:$0xff] %v1506_v6   ;;  %v2198_v9 = vmul.f32 %v1598_v7, %v2144_v43  ;;  %v2201_v10 = vmul.f32 %v1598_v7, %v2139_v42 }
 0x14e   : > { %v575_v13 = vpop.f32.mrf.mxu0 }
 0x14f   : > { %v2210_v14 = vsel %vm919_vm0, %v2198_v9, 0.0  ;;  %v2215_v15 = vsel %vm919_vm0, %v2201_v10, 0.0  ;;  %v1034_v16 = vsel %vm2156_vm3, %v2198_v9, 0.0  ;;  %v1082_v17 = vsel %vm2156_vm3, %v2201_v10, 0.0 }
 0x150   : > { %987 = vadd.xlane.f32.xlu0 %v971_v11  ;;  %1094 = vadd.xlane.f32.xlu1 %v1075_v12  ;;  %v1599_v20 = vpop.f32.mrf.mxu0  ;;  %v2227_v21 = vmul.f32 %v2144_v43, %v575_v13  ;;  %v2230_v22 = vmul.f32 %v2139_v42, %v575_v13 }
 0x151   : > { %v1521_v24 = vpack.c.bf16 %v1599_v20, %v1598_v7  ;;  %v2236_v25 = vmul.f32 %v1599_v20, %v2144_v43  ;;  %v2239_v26 = vmul.f32 %v1599_v20, %v2139_v42  ;;  %v885_v7 = vmul.f32 %v2179_v0, %v2144_v43 }
 0x152   : > { %v578_v27 = vpop.f32.mrf.mxu0  ;;  %v2244_v28 = vsel %vm919_vm0, %v2227_v21, 0.0  ;;  %v2249_v29 = vsel %vm919_vm0, %v2230_v22, 0.0  ;;  %v1032_v30 = vsel %vm2156_vm3, %v2227_v21, 0.0  ;;  %v1080_v31 = vsel %vm2156_vm3, %v2230_v22, 0.0 }
 0x153   : > { %1537 = vst [vmem:[%s2161_s19 + $0x28] sm:$0xff] %v1521_v24   ;;  %v1516_v32 = vpack.c.bf16 %v578_v27, %v575_v13  ;;  %v2261_v33 = vsel %vm919_vm0, %v2236_v25, 0.0  ;;  %v2266_v34 = vsel %vm919_vm0, %v2239_v26, 0.0  ;;  %v1035_v35 = vsel %vm2156_vm3, %v2236_v25, 0.0 }
 0x154   : > { %1040 = vadd.xlane.f32.xlu0 %v1024_v18  ;;  %989 = vadd.xlane.f32.xlu1 %v972_v23  ;;  %v1083_v37 = vsel %vm2156_vm3, %v2239_v26, 0.0  ;;  %v2277_v38 = vmul.f32 %v2144_v43, %v578_v27  ;;  %v1602_v39 = vpop.f32.mrf.mxu0  ;;  %v2280_v40 = vmul.f32 %v2139_v42, %v578_v27  ;;  %v1031_v1 = vsel %vm2156_vm3, %v885_v7, 0.0 }
 0x155   : > { %1536 = vst [vmem:[%s2161_s19 + $0x20] sm:$0xff] %v1516_v32   ;;  %v2288_v46 = vmul.f32 %v1602_v39, %v2144_v43  ;;  %v2291_v47 = vmul.f32 %v1602_v39, %v2139_v42  ;;  %v1030_v32 = vsel %vm2156_vm3, %v884_v45, 0.0 }
 0x156   : > { %v2296_v48 = vsel %vm919_vm0, %v2277_v38, 0.0  ;;  %v2301_v49 = vsel %vm919_vm0, %v2280_v40, 0.0  ;;  %v591_v50 = vpop.f32.mrf.mxu0  ;;  %v1033_v52 = vsel %vm2156_vm3, %v2277_v38, 0.0  ;;  %v1081_v53 = vsel %vm2156_vm3, %v2280_v40, 0.0 }
 0x157   : > { %v2312_v54 = vsel %vm919_vm0, %v2288_v46, 0.0  ;;  %v2317_v55 = vsel %vm919_vm0, %v2291_v47, 0.0  ;;  %v1038_v56 = vsel %vm2156_vm3, %v2288_v46, 0.0  ;;  %v2323_v57 = vmul.f32 %v2144_v43, %v591_v50 }
 0x158   : > { %1088 = vadd.xlane.f32.xlu0 %v1072_v36  ;;  %1042 = vadd.xlane.f32.xlu1 %v1025_v44  ;;  %v1603_v62 = vpop.f32.mrf.mxu0  ;;  %v2331_v63 = vmul.f32 %v2139_v42, %v591_v50 }
 0x159   : > { %v1531_v2 = vpack.c.bf16 %v1603_v62, %v1602_v39  ;;  %v2337_v4 = vmul.f32 %v1603_v62, %v2144_v43  ;;  %v2340_v5 = vmul.f32 %v1603_v62, %v2139_v42  ;;  %v2345_v6 = vsel %vm919_vm0, %v2323_v57, 0.0 }
 0x15a   : > { %v594_v8 = vpop.f32.mrf.mxu0  ;;  %v2352_v11 = vsel %vm919_vm0, %v2331_v63, 0.0  ;;  %v1036_v12 = vsel %vm2156_vm3, %v2323_v57, 0.0  ;;  %v1084_v13 = vsel %vm2156_vm3, %v2331_v63, 0.0  ;;  %v906_v62 = vmul.f32 %v2169_v59, %v2139_v42 }
 0x15b   : > { %1539 = vst [vmem:[%s2161_s19 + $0x38] sm:$0xff] %v1531_v2   ;;  %v1526_v18 = vpack.c.bf16 %v594_v8, %v591_v50  ;;  %v2362_v19 = vmul.f32 %v2144_v43, %v594_v8  ;;  %v2365_v20 = vmul.f32 %v2139_v42, %v594_v8  ;;  %v2370_v23 = vsel %vm919_vm0, %v2337_v4, 0.0 }
 0x15c   : > { %1090 = vadd.xlane.f32.xlu1 %v1073_v58  ;;  %941 = vadd.xlane.f32.xlu0 %v924_v61  ;;  %v2375_v24 = vsel %vm919_vm0, %v2340_v5, 0.0  ;;  %v1039_v27 = vsel %vm2156_vm3, %v2337_v4, 0.0  ;;  %v929_v58 = vsel %vm919_vm0, %v884_v45, 0.0  ;;  %v930_v61 = vsel %vm919_vm0, %v885_v7, 0.0 }
 0x15d   : > { %1538 = vst [vmem:[%s2161_s19 + $0x30] sm:$0xff] %v1526_v18   ;;  %v2387_v36 = vsel %vm919_vm0, %v2362_v19, 0.0  ;;  %v2392_v39 = vsel %vm919_vm0, %v2365_v20, 0.0  ;;  %v1037_v44 = vsel %vm2156_vm3, %v2362_v19, 0.0  ;;  %v1085_v50 = vsel %vm2156_vm3, %v2365_v20, 0.0 }
 0x15e   : > { %v907_v2 = vmul.f32 %v2179_v0, %v2139_v42  ;;  %v977_v8 = vsel %vm919_vm0, %v906_v62, 0.0  ;;  %v1078_v59 = vsel %vm2156_vm3, %v906_v62, 0.0  ;;  %v904_v7 = vmul.f32 %v2139_v42, %v2172_v60 }
 0x15f   : > { %v2799_v57 = vsel %vm2156_vm3, %v2291_v47, 0.0  ;;  %v2800_v63 = vsel %vm2156_vm3, %v2340_v5, 0.0 }
 0x160   : > { %951 = vadd.xlane.f32.xlu0 %v929_v58  ;;  %953 = vadd.xlane.f32.xlu1 %v930_v61  ;;  %v978_v18 = vsel %vm919_vm0, %v907_v2, 0.0  ;;  %v1079_v0 = vsel %vm2156_vm3, %v907_v2, 0.0  ;;  %v882_v58 = vmul.f32 %v2144_v43, %v2172_v60  ;;  %v883_v61 = vmul.f32 %v2144_v43, %v2184_v3 }
 0x161   : > { %v975_v62 = vsel %vm919_vm0, %v904_v7, 0.0 }
 0x162   : > { %v927_v45 = vsel %vm919_vm0, %v882_v58, 0.0  ;;  %v1028_v2 = vsel %vm2156_vm3, %v882_v58, 0.0 }
 0x164   : > { %999 = vadd.xlane.f32.xlu0 %v977_v8  ;;  %1001 = vadd.xlane.f32.xlu1 %v978_v18  ;;  %v1029_v8 = vsel %vm2156_vm3, %v883_v61, 0.0 }
 0x168   : > { %1052 = vadd.xlane.f32.xlu0 %v1030_v32  ;;  %1054 = vadd.xlane.f32.xlu1 %v1031_v1  ;;  %v928_v1 = vsel %vm919_vm0, %v883_v61, 0.0  ;;  %v905_v32 = vmul.f32 %v2139_v42, %v2184_v3  ;;  %v1076_v42 = vsel %vm2156_vm3, %v904_v7, 0.0  ;;  %v1622_v3 = vpop.f32.mrf.mxu1 }
 0x169   : > { %v800_v9 = vadd.f32 %v1622_v3, %v2487_v41 }
 0x16a   : > { %v976_v43 = vsel %vm919_vm0, %v905_v32, 0.0  ;;  %v1077_v60 = vsel %vm2156_vm3, %v905_v32, 0.0  ;;  %v791_v10 = vpop.f32.mrf.mxu1 }
 0x16b   : > { %856 = vst [vmem:[%s2494_s22 + $0x10] sm:$0xff] %v800_v9 }
 0x16c   : > { %1100 = vadd.xlane.f32.xlu0 %v1078_v59  ;;  %1102 = vadd.xlane.f32.xlu1 %v1079_v0 }
 0x170   : > { %947 = vadd.xlane.f32.xlu0 %v927_v45  ;;  %949 = vadd.xlane.f32.xlu1 %v928_v1 }
 0x174   : > { %995 = vadd.xlane.f32.xlu0 %v975_v62  ;;  %997 = vadd.xlane.f32.xlu1 %v976_v43 }
 0x178   : > { %1048 = vadd.xlane.f32.xlu0 %v1028_v2  ;;  %1050 = vadd.xlane.f32.xlu1 %v1029_v8 }
 0x17c   : > { %1096 = vadd.xlane.f32.xlu0 %v1076_v42  ;;  %1098 = vadd.xlane.f32.xlu1 %v1077_v60 }
 0x180   : > { %959 = vadd.xlane.f32.xlu0 %v2210_v14  ;;  %961 = vadd.xlane.f32.xlu1 %v2261_v33  ;;  %v792_v14 = vadd.f32 %v2487_v41, %v791_v10 }
 0x182   : > { %854 = vst [vmem:[%s2494_s22] sm:$0xff] %v792_v14 }
 0x184   : > { %1007 = vadd.xlane.f32.xlu0 %v2215_v15  ;;  %1009 = vadd.xlane.f32.xlu1 %v2266_v34  ;;  %v1623_v15 = vpop.f32.mrf.mxu1 }
 0x188   : > { %1060 = vadd.xlane.f32.xlu0 %v1034_v16  ;;  %1062 = vadd.xlane.f32.xlu1 %v1035_v35  ;;  %v803_v16 = vadd.f32 %v1623_v15, %v2487_v41 }
 0x18a   : > { %857 = vst [vmem:[%s2494_s22 + $0x18] sm:$0xff] %v803_v16 }
 0x18c   : > { %1108 = vadd.xlane.f32.xlu0 %v1082_v17  ;;  %1110 = vadd.xlane.f32.xlu1 %v1083_v37  ;;  %v794_v17 = vpop.f32.mrf.mxu1 }
 0x18d   : > { %v795_v21 = vadd.f32 %v2487_v41, %v794_v17 }
 0x18e   : > { %v1626_v22 = vpop.f32.mrf.mxu1 }
 0x18f   : > { %855 = vst [vmem:[%s2494_s22 + $0x8] sm:$0xff] %v795_v21  ;;  %v816_v25 = vadd.f32 %v1626_v22, %v2487_v41 }
 0x190   : > { %955 = vadd.xlane.f32.xlu0 %v2244_v28  ;;  %957 = vadd.xlane.f32.xlu1 %v2296_v48  ;;  %v807_v26 = vpop.f32.mrf.mxu1 }
 0x191   : > { %860 = vst [vmem:[%s2494_s22 + $0x30] sm:$0xff] %v816_v25  ;;  %v808_v28 = vadd.f32 %v2487_v41, %v807_v26 }
 0x193   : > { %858 = vst [vmem:[%s2494_s22 + $0x20] sm:$0xff] %v808_v28 }
 0x194   : > { %1003 = vadd.xlane.f32.xlu0 %v2249_v29  ;;  %1005 = vadd.xlane.f32.xlu1 %v2301_v49  ;;  %v1627_v29 = vpop.f32.mrf.mxu1 }
 0x198   : > { %1056 = vadd.xlane.f32.xlu0 %v1032_v30  ;;  %1058 = vadd.xlane.f32.xlu1 %v1033_v52  ;;  %v819_v30 = vadd.f32 %v1627_v29, %v2487_v41 }
 0x19a   : > { %861 = vst [vmem:[%s2494_s22 + $0x38] sm:$0xff] %v819_v30 }
 0x19c   : > { %1104 = vadd.xlane.f32.xlu0 %v1080_v31  ;;  %1106 = vadd.xlane.f32.xlu1 %v1081_v53  ;;  %v810_v31 = vpop.f32.mrf.mxu1 }
 0x19d   : > { %v811_v33 = vadd.f32 %v2487_v41, %v810_v31 }
 0x19e   : > { %v1630_v34 = vpop.f32.mrf.mxu1 }
 0x19f   : > { %859 = vst [vmem:[%s2494_s22 + $0x28] sm:$0xff] %v811_v33  ;;  %v832_v35 = vadd.f32 %v1630_v34, %v2487_v41 }
 0x1a0   : > { %967 = vadd.xlane.f32.xlu0 %v2312_v54  ;;  %969 = vadd.xlane.f32.xlu1 %v2370_v23  ;;  %v823_v37 = vpop.f32.mrf.mxu1 }
 0x1a1   : > { %864 = vst [vmem:[%s2494_s22 + $0x50] sm:$0xff] %v832_v35  ;;  %v824_v38 = vadd.f32 %v2487_v41, %v823_v37 }
 0x1a2   : > { %v1631_v40 = vpop.f32.mrf.mxu1 }
 0x1a3   : > { %862 = vst [vmem:[%s2494_s22 + $0x40] sm:$0xff] %v824_v38  ;;  %v835_v46 = vadd.f32 %v1631_v40, %v2487_v41 }
 0x1a4   : > { %1015 = vadd.xlane.f32.xlu0 %v2317_v55  ;;  %1017 = vadd.xlane.f32.xlu1 %v2375_v24  ;;  %v826_v48 = vpop.f32.mrf.mxu1 }
 0x1a5   : > { %865 = vst [vmem:[%s2494_s22 + $0x58] sm:$0xff] %v835_v46  ;;  %v827_v49 = vadd.f32 %v2487_v41, %v826_v48 }
 0x1a6   : > { %v1634_v52 = vpop.f32.mrf.mxu1 }
 0x1a7   : > { %863 = vst [vmem:[%s2494_s22 + $0x48] sm:$0xff] %v827_v49  ;;  %v848_v53 = vadd.f32 %v1634_v52, %v2487_v41 }
 0x1a8   : > { %1068 = vadd.xlane.f32.xlu0 %v1038_v56  ;;  %1070 = vadd.xlane.f32.xlu1 %v1039_v27  ;;  %v839_v54 = vpop.f32.mrf.mxu1 }
 0x1a9   : > { %868 = vst [vmem:[%s2494_s22 + $0x70] sm:$0xff] %v848_v53  ;;  %v840_v55 = vadd.f32 %v2487_v41, %v839_v54 }
 0x1aa   : > { %v1635_v56 = vpop.f32.mrf.mxu1 }
 0x1ab   : > { %866 = vst [vmem:[%s2494_s22 + $0x60] sm:$0xff] %v840_v55  ;;  %v851_v4 = vadd.f32 %v1635_v56, %v2487_v41 }
 0x1ac   : > { %963 = vadd.xlane.f32.xlu0 %v2345_v6  ;;  %965 = vadd.xlane.f32.xlu1 %v2387_v36  ;;  %v842_v6 = vpop.f32.mrf.mxu1 }
 0x1ad   : > { %869 = vst [vmem:[%s2494_s22 + $0x78] sm:$0xff] %v851_v4 }
 0x1b0   : > { %1011 = vadd.xlane.f32.xlu0 %v2352_v11  ;;  %1013 = vadd.xlane.f32.xlu1 %v2392_v39  ;;  %v843_v11 = vadd.f32 %v2487_v41, %v842_v6 }
 0x1b2   : > { %867 = vst [vmem:[%s2494_s22 + $0x68] sm:$0xff] %v843_v11 }
 0x1b4   : > { %1064 = vadd.xlane.f32.xlu0 %v1036_v12  ;;  %1066 = vadd.xlane.f32.xlu1 %v1037_v44 }
 0x1b8   : > { %1112 = vadd.xlane.f32.xlu0 %v1084_v13  ;;  %1114 = vadd.xlane.f32.xlu1 %v1085_v50 }
 0x1bc   : > { %1116 = vadd.xlane.f32.xlu0 %v2799_v57  ;;  %1118 = vadd.xlane.f32.xlu1 %v2800_v63 }
 0x1c9   : > { %v2586_v51 = vpop.xlane.xlu0 %991  ;;  %v944_v47 = vpop.xlane.xlu1 %943 }
 0x1ca   : > { %1825 = shalt.err (!%p1822_p13)
}
 0x1cb   : > { %s1826_s17 = scalar_lea.hbm %s2582_s29, 1024  ;;  %s1830_s27 = scalar_lea.hbm %s2772_s6, 2048 }
 0x1cc   : > { %p1827_p5 = scmp.ne.s32.totalorder %s2582_s29, %s1826_s17  ;;  %p1831_p8 = scmp.lt.s32.totalorder %s2582_s29, %s2772_s6 }
 0x1cd   : > { %p1832_p3 = scmp.lt.s32.totalorder %s1830_s27, %s1826_s17 }
 0x1ce   : > { %p1828_p0 = pnand %p1827_p5, %p2801_p1 }
 0x1cf   : > { %p1833_p11 = por %p1832_p3, %p1831_p8 }
 0x1d0   : > { %p1829_p4 = pneg %p1828_p0 }
 0x1d2   : > { %p1834_p10 = pnand %p1833_p11, %p1829_p4 }
 0x1d4   : > { %1837 = shalt.err (!%p1834_p10)
}
 0x1d5   : > { %s1920_s26 = smov 64   ;;  %s1921_s25 = smov 4   ;;  %vm1120_vm4 = vcmask 7168   ;;  %vm1137_vm5 = vcmask 15360   ;;  %v1045_v5 = vpop.xlane.xlu0 %1044  ;;  %v946_v12 = vpop.xlane.xlu1 %945 }
 0x1d6   : > { %s2802_s24 = scalar_lea.sflag [#allocation4], %s2102_s5  ;;  %s2803_s28 = sshll.u32 %s1996_s13, 11  ;;  %v1123_v13 = vsel %vm1120_vm4, %v944_v47, %v1045_v5 }
 0x1d7   : > { %1646 = dma.vmem_to_hbm [thread:$0]  (%p2801_p1), %s2584_s23, 1024, %s2582_s29, %s2802_s24, %s1920_s26, %s1920_s26, %s1921_s25  }
 0x1d8   : > { %s2616_s17 = scalar_lea.hbm %s2773_s7, %s2803_s28  ;;  %s1231_s20 = sshll.u32 %s2494_s22, 4  ;;  %s2619_s20 = int_to_ptr.vmem [resolvable:$true] %s1231_s20 }
 0x1d9   : > { %s1192_s27 = scalar_lea.sflag [#allocation10], %s2102_s5  ;;  %s1838_s23 = scalar_lea.vmem %s2619_s20, 2048 }
 0x1da   : > { %p1839_p2 = scmp.ne.s32.totalorder %s2619_s20, %s1838_s23  ;;  %s1922_s13 = smov [#allocation9]  }
 0x1db   : > { %s1842_s29 = sshll.u32 %s1922_s13, 4  ;;  %s1843_s29 = int_to_ptr.vmem [resolvable:$false] %s1842_s29 }
 0x1dc   : > { %p1840_p6 = pnand %p1839_p2, %p2801_p1  ;;  %s1844_s22 = scalar_lea.vmem %s1843_s29, 4096 }
 0x1dd   : > { %p1845_p7 = scmp.lt.s32.totalorder %s2619_s20, %s1843_s29  ;;  %p1846_p9 = scmp.lt.s32.totalorder %s1844_s22, %s1838_s23 }
 0x1de   : > { %p1841_p12 = pneg %p1840_p6 }
 0x1df   : > { %p1847_p13 = por %p1846_p9, %p1845_p7 }
 0x1e1   : > { %p1848_p5 = pnand %p1847_p13, %p1841_p12 }
 0x1e3   : > { %1851 = shalt.err (!%p1848_p5)
}
 0x1e4   : > { %s1852_s26 = scalar_lea.hbm %s2616_s17, 2048  ;;  %s1856_s28 = scalar_lea.hbm %s2773_s7, 4096 }
 0x1e5   : > { %p1853_p0 = scmp.ne.s32.totalorder %s2616_s17, %s1852_s26  ;;  %p1857_p3 = scmp.lt.s32.totalorder %s2616_s17, %s2773_s7 }
 0x1e6   : > { %p1858_p11 = scmp.lt.s32.totalorder %s1856_s28, %s1852_s26 }
 0x1e7   : > { %p1854_p4 = pnand %p1853_p0, %p2801_p1 }
 0x1e8   : > { %p1859_p10 = por %p1858_p11, %p1857_p3 }
 0x1e9   : > { %p1855_p8 = pneg %p1854_p4 }
 0x1eb   : > { %p1860_p2 = pnand %p1859_p10, %p1855_p8 }
 0x1ed   : > { %1863 = shalt.err (!%p1860_p2)
}
 0x1ee   : > { %s1923_s23 = smov 128   ;;  %s1924_s13 = smov 8   ;;  %1140 = vst.msk [vmem:[%s2575_s15 + $0x10] sm:$0xff] %vm1137_vm5, %v1123_v13  ;;  %v1093_v19 = vpop.xlane.xlu0 %1092  ;;  %v994_v20 = vpop.xlane.xlu1 %993 }
 0x1ef   : > { %1647 = dma.vmem_to_hbm [thread:$0]  (%p2801_p1), %s2619_s20, 2048, %s2616_s17, %s1192_s27, %s1923_s23, %s1923_s23, %s1924_s13   ;;  %v1156_v23 = vsel %vm1120_vm4, %v2586_v51, %v1093_v19 }
 0x1f0   : > { %s2804_s29 = sshll.u32 %s2813_s1, 3 }
 0x1f1   : > { %s2652_s25 = scalar_lea.vmem %s2775_s9, %s2804_s29 }
 0x1f2   : > { %1172 = vst.msk [vmem:[%s2652_s25 + $0x10] sm:$0xff] %vm1137_vm5, %v1156_v23  ;;  %v940_v24 = vpop.xlane.xlu0 %939  ;;  %v1047_v27 = vpop.xlane.xlu1 %1046 }
 0x1f3   : > { %v1124_v36 = vsel %vm1120_vm4, %v946_v12, %v1047_v27 }
 0x1f4   : > { %1141 = vst.msk [vmem:[%s2575_s15 + $0x18] sm:$0xff] %vm1137_vm5, %v1124_v36 }
 0x1f6   : > { %v988_v39 = vpop.xlane.xlu0 %987  ;;  %v1095_v44 = vpop.xlane.xlu1 %1094 }
 0x1f7   : > { %v1157_v50 = vsel %vm1120_vm4, %v994_v20, %v1095_v44 }
 0x1f8   : > { %1173 = vst.msk [vmem:[%s2652_s25 + $0x18] sm:$0xff] %vm1137_vm5, %v1157_v50 }
 0x1fa   : > { %v1041_v18 = vpop.xlane.xlu0 %1040  ;;  %v990_v59 = vpop.xlane.xlu1 %989 }
 0x1fb   : > { %v1121_v0 = vsel %vm1120_vm4, %v940_v24, %v1041_v18 }
 0x1fc   : > { %1138 = vst.msk [vmem:[%s2575_s15] sm:$0xff] %vm1137_vm5, %v1121_v0 }
 0x1fe   : > { %v1089_v58 = vpop.xlane.xlu0 %1088  ;;  %v1043_v61 = vpop.xlane.xlu1 %1042 }
 0x1ff   : > { %v1154_v45 = vsel %vm1120_vm4, %v988_v39, %v1089_v58 }
 0x200   : > { %1170 = vst.msk [vmem:[%s2652_s25] sm:$0xff] %vm1137_vm5, %v1154_v45 }
 0x202   : > { %v1091_v1 = vpop.xlane.xlu1 %1090  ;;  %v942_v7 = vpop.xlane.xlu0 %941 }
 0x203   : > { %v1155_v32 = vsel %vm1120_vm4, %v990_v59, %v1091_v1  ;;  %v1122_v62 = vsel %vm1120_vm4, %v942_v7, %v1043_v61 }
 0x204   : > { %1171 = vst.msk [vmem:[%s2652_s25 + $0x8] sm:$0xff] %vm1137_vm5, %v1155_v32  ;;  %1139 = vst.msk [vmem:[%s2575_s15 + $0x8] sm:$0xff] %vm1137_vm5, %v1122_v62 }
 0x206   : > { %v952_v43 = vpop.xlane.xlu0 %951  ;;  %v954_v2 = vpop.xlane.xlu1 %953 }
 0x20a   : > { %v1000_v8 = vpop.xlane.xlu0 %999  ;;  %v1002_v42 = vpop.xlane.xlu1 %1001 }
 0x20e   : > { %v1053_v60 = vpop.xlane.xlu0 %1052  ;;  %v1055_v41 = vpop.xlane.xlu1 %1054 }
 0x20f   : > { %v1127_v3 = vsel %vm1120_vm4, %v952_v43, %v1053_v60  ;;  %v1128_v9 = vsel %vm1120_vm4, %v954_v2, %v1055_v41 }
 0x210   : > { %1144 = vst.msk [vmem:[%s2575_s15 + $0x30] sm:$0xff] %vm1137_vm5, %v1127_v3  ;;  %1145 = vst.msk [vmem:[%s2575_s15 + $0x38] sm:$0xff] %vm1137_vm5, %v1128_v9 }
 0x212   : > { %v1101_v10 = vpop.xlane.xlu0 %1100  ;;  %v1103_v14 = vpop.xlane.xlu1 %1102 }
 0x213   : > { %v1160_v15 = vsel %vm1120_vm4, %v1000_v8, %v1101_v10  ;;  %v1161_v16 = vsel %vm1120_vm4, %v1002_v42, %v1103_v14 }
 0x214   : > { %1176 = vst.msk [vmem:[%s2652_s25 + $0x30] sm:$0xff] %vm1137_vm5, %v1160_v15  ;;  %1177 = vst.msk [vmem:[%s2652_s25 + $0x38] sm:$0xff] %vm1137_vm5, %v1161_v16 }
 0x216   : > { %v948_v17 = vpop.xlane.xlu0 %947  ;;  %v950_v21 = vpop.xlane.xlu1 %949 }
 0x21a   : > { %v996_v22 = vpop.xlane.xlu0 %995  ;;  %v998_v25 = vpop.xlane.xlu1 %997 }
 0x21e   : > { %v1049_v26 = vpop.xlane.xlu0 %1048  ;;  %v1051_v28 = vpop.xlane.xlu1 %1050 }
 0x21f   : > { %v1125_v29 = vsel %vm1120_vm4, %v948_v17, %v1049_v26  ;;  %v1126_v30 = vsel %vm1120_vm4, %v950_v21, %v1051_v28 }
 0x220   : > { %1142 = vst.msk [vmem:[%s2575_s15 + $0x20] sm:$0xff] %vm1137_vm5, %v1125_v29  ;;  %1143 = vst.msk [vmem:[%s2575_s15 + $0x28] sm:$0xff] %vm1137_vm5, %v1126_v30 }
 0x222   : > { %v1097_v31 = vpop.xlane.xlu0 %1096  ;;  %v1099_v33 = vpop.xlane.xlu1 %1098 }
 0x223   : > { %v1158_v34 = vsel %vm1120_vm4, %v996_v22, %v1097_v31  ;;  %v1159_v35 = vsel %vm1120_vm4, %v998_v25, %v1099_v33 }
 0x224   : > { %1174 = vst.msk [vmem:[%s2652_s25 + $0x20] sm:$0xff] %vm1137_vm5, %v1158_v34  ;;  %1175 = vst.msk [vmem:[%s2652_s25 + $0x28] sm:$0xff] %vm1137_vm5, %v1159_v35 }
 0x226   : > { %v960_v37 = vpop.xlane.xlu0 %959  ;;  %v962_v38 = vpop.xlane.xlu1 %961 }
 0x22a   : > { %v1008_v40 = vpop.xlane.xlu0 %1007  ;;  %v1010_v46 = vpop.xlane.xlu1 %1009 }
 0x22e   : > { %v1061_v48 = vpop.xlane.xlu0 %1060  ;;  %v1063_v49 = vpop.xlane.xlu1 %1062 }
 0x22f   : > { %v1131_v52 = vsel %vm1120_vm4, %v960_v37, %v1061_v48  ;;  %v1132_v53 = vsel %vm1120_vm4, %v962_v38, %v1063_v49 }
 0x230   : > { %1148 = vst.msk [vmem:[%s2575_s15 + $0x50] sm:$0xff] %vm1137_vm5, %v1131_v52  ;;  %1149 = vst.msk [vmem:[%s2575_s15 + $0x58] sm:$0xff] %vm1137_vm5, %v1132_v53 }
 0x232   : > { %v1109_v54 = vpop.xlane.xlu0 %1108  ;;  %v1111_v55 = vpop.xlane.xlu1 %1110 }
 0x233   : > { %v1164_v56 = vsel %vm1120_vm4, %v1008_v40, %v1109_v54  ;;  %v1165_v57 = vsel %vm1120_vm4, %v1010_v46, %v1111_v55 }
 0x234   : > { %1180 = vst.msk [vmem:[%s2652_s25 + $0x50] sm:$0xff] %vm1137_vm5, %v1164_v56  ;;  %1181 = vst.msk [vmem:[%s2652_s25 + $0x58] sm:$0xff] %vm1137_vm5, %v1165_v57 }
 0x236   : > { %v956_v63 = vpop.xlane.xlu0 %955  ;;  %v958_v4 = vpop.xlane.xlu1 %957 }
 0x23a   : > { %v1004_v6 = vpop.xlane.xlu0 %1003  ;;  %v1006_v11 = vpop.xlane.xlu1 %1005 }
 0x23e   : > { %v1057_v51 = vpop.xlane.xlu0 %1056  ;;  %v1059_v47 = vpop.xlane.xlu1 %1058 }
 0x23f   : > { %v1129_v5 = vsel %vm1120_vm4, %v956_v63, %v1057_v51  ;;  %v1130_v12 = vsel %vm1120_vm4, %v958_v4, %v1059_v47 }
 0x240   : > { %1146 = vst.msk [vmem:[%s2575_s15 + $0x40] sm:$0xff] %vm1137_vm5, %v1129_v5  ;;  %1147 = vst.msk [vmem:[%s2575_s15 + $0x48] sm:$0xff] %vm1137_vm5, %v1130_v12 }
 0x242   : > { %v1105_v13 = vpop.xlane.xlu0 %1104  ;;  %v1107_v19 = vpop.xlane.xlu1 %1106 }
 0x243   : > { %v1162_v20 = vsel %vm1120_vm4, %v1004_v6, %v1105_v13  ;;  %v1163_v23 = vsel %vm1120_vm4, %v1006_v11, %v1107_v19 }
 0x244   : > { %1178 = vst.msk [vmem:[%s2652_s25 + $0x40] sm:$0xff] %vm1137_vm5, %v1162_v20  ;;  %1179 = vst.msk [vmem:[%s2652_s25 + $0x48] sm:$0xff] %vm1137_vm5, %v1163_v23 }
 0x246   : > { %v968_v24 = vpop.xlane.xlu0 %967  ;;  %v970_v27 = vpop.xlane.xlu1 %969 }
 0x24a   : > { %v1016_v36 = vpop.xlane.xlu0 %1015  ;;  %v1018_v39 = vpop.xlane.xlu1 %1017 }
 0x24e   : > { %v1069_v44 = vpop.xlane.xlu0 %1068  ;;  %v1071_v50 = vpop.xlane.xlu1 %1070 }
 0x24f   : > { %v1135_v18 = vsel %vm1120_vm4, %v968_v24, %v1069_v44  ;;  %v1136_v59 = vsel %vm1120_vm4, %v970_v27, %v1071_v50 }
 0x250   : > { %1152 = vst.msk [vmem:[%s2575_s15 + $0x70] sm:$0xff] %vm1137_vm5, %v1135_v18  ;;  %1153 = vst.msk [vmem:[%s2575_s15 + $0x78] sm:$0xff] %vm1137_vm5, %v1136_v59 }
 0x252   : > { %v964_v0 = vpop.xlane.xlu0 %963  ;;  %v966_v58 = vpop.xlane.xlu1 %965 }
 0x256   : > { %v1012_v61 = vpop.xlane.xlu0 %1011  ;;  %v1014_v45 = vpop.xlane.xlu1 %1013 }
 0x25a   : > { %v1065_v1 = vpop.xlane.xlu0 %1064  ;;  %v1067_v7 = vpop.xlane.xlu1 %1066 }
 0x25b   : > { %v1133_v32 = vsel %vm1120_vm4, %v964_v0, %v1065_v1  ;;  %v1134_v62 = vsel %vm1120_vm4, %v966_v58, %v1067_v7 }
 0x25c   : > { %1150 = vst.msk [vmem:[%s2575_s15 + $0x60] sm:$0xff] %vm1137_vm5, %v1133_v32  ;;  %1151 = vst.msk [vmem:[%s2575_s15 + $0x68] sm:$0xff] %vm1137_vm5, %v1134_v62 }
 0x25e   : > { %v1113_v43 = vpop.xlane.xlu0 %1112  ;;  %v1115_v2 = vpop.xlane.xlu1 %1114 }
 0x25f   : > { %v1166_v8 = vsel %vm1120_vm4, %v1012_v61, %v1113_v43  ;;  %v1167_v42 = vsel %vm1120_vm4, %v1014_v45, %v1115_v2 }
 0x260   : > { %1182 = vst.msk [vmem:[%s2652_s25 + $0x60] sm:$0xff] %vm1137_vm5, %v1166_v8  ;;  %1183 = vst.msk [vmem:[%s2652_s25 + $0x68] sm:$0xff] %vm1137_vm5, %v1167_v42 }
 0x262   : > { %v1117_v60 = vpop.xlane.xlu0 %1116  ;;  %v1119_v41 = vpop.xlane.xlu1 %1118 }
 0x263   : > { %v1168_v3 = vsel %vm1120_vm4, %v1016_v36, %v1117_v60  ;;  %v1169_v9 = vsel %vm1120_vm4, %v1018_v39, %v1119_v41 }
 0x264   : > { %1184 = vst.msk [vmem:[%s2652_s25 + $0x70] sm:$0xff] %vm1137_vm5, %v1168_v3  ;;  %1185 = vst.msk [vmem:[%s2652_s25 + $0x78] sm:$0xff] %vm1137_vm5, %v1169_v9 }
 0x265 PF: > { %s1254_s21 = sand.u32 1, %s1898_s30   ;;  %p2805_p1 = scmp.ne.s32.totalorder %s2784_s16, 0 }
 0x266   : > { %p2806_p6 = scmp.ge.s32.totalorder %s1910_s12, 2  ;;  %s1255_s5 = scalar_lea.sflag [#allocation4], %s1254_s21 }
 0x268   : > { %p1662_p12 = pnand %p2806_p6, %p2805_p1 }
 0x26a   : > { %p1663_p7 = pneg %p1662_p12 }
 0x26c   : > { %1889 = dma.done.wait (%p1663_p7), %s1255_s5, 1024  }
 0x26d   : > { %1891 = vsyncadd (%p1663_p7), %s1255_s5, 4294966272  ;;  %s1264_s1 = scalar_lea.sflag [#allocation10], %s1254_s21 }
 0x26e   : > { %1893 = dma.done.wait (%p1663_p7), %s1264_s1, 2048  }
 0x26f   : > { %1895 = vsyncadd (%p1663_p7), %s1264_s1, 4294965248  ;;  %s2807_s15 = sld [smem:[#allocation15_spill]]  ;;  %p27_p9 = scmp.ge.s32.totalorder %s2047_s18, 4  }
 0x270   : > { %s2808_s30 = smov %s1902_s10  ;;  %s2809_s10 = smov %s1906_s11 }
 0x271   : > { %s2811_s12 = smov %s2047_s18  ;;  %29 = sbr.rel (!%p27_p9) target bundleno = 11 (0xb), region = 138 }
 0x275   : > { %s2810_s11 = smov %s2807_s15 }
 0x276   :  { %1285 = vsyncpa [#allocation3], 1 }
 0x277   :  { %1287 = vsyncpa [#allocation3 + $0x1], 1 }
 0x278   :  { %1288 = vsyncpa [#allocation6], 1 }
 0x279   :  { %1289 = vsyncpa [#allocation4], 1 }
 0x27a   :  { %1291 = vsyncpa [#allocation4 + $0x1], 1 }
 0x27b   :  { %1292 = vsyncpa [#allocation10], 1 }
 0x27c   :  { %1294 = vsyncpa [#allocation10 + $0x1], 1 }

</bundles_post_ra>
